<compile_context>
chip_gen: v7x
topology: tpu7x:2x2x1
jax: 0.10.0
libtpu: 0.0.40
codegen_flags: <defaults>
</compile_context>

<pallas_src>
import functools

import jax
import jax.numpy as jnp
from jax.experimental import pallas as pl
from jax.experimental.pallas import tpu as pltpu


def _round_up(x, m):
    return ((x + m - 1) // m) * m


def _fused_kernel(action_dim, out_cols,
                  x_ref, w1_ref, b1_ref, w2_ref, b2_ref, w3_ref, b3_ref,
                  act_ref, val_ref):
    wdt = w1_ref.dtype

    x = x_ref[...]
    if x.dtype != wdt:           # no-op on the pre-cast bf16 / pure-f32 paths
        x = x.astype(wdt)

    # ---- layer 1: x @ [Wp1 | Wv1] + [bp1 | bv1], ReLU ----
    h = jnp.dot(x, w1_ref[...], preferred_element_type=jnp.float32)
    h = jnp.maximum(h + b1_ref[...], 0.0)

    # ---- layer 2: h @ blockdiag(Wp2, Wv2) + [bp2 | bv2], ReLU ----
    h = jnp.dot(h.astype(wdt), w2_ref[...], preferred_element_type=jnp.float32)
    h = jnp.maximum(h + b2_ref[...], 0.0)

    # ---- layer 3: h @ [Wp3 ; Wv3] (lane-padded to 128 for a safe MXU shape) ----
    o = jnp.dot(h.astype(wdt), w3_ref[...], preferred_element_type=jnp.float32)
    o = o[:, :out_cols] + b3_ref[...]          # only the useful columns

    # tanh only on the action columns; value column passes through.
    act_ref[...] = jnp.tanh(o[:, :action_dim]).astype(act_ref.dtype)
    val_ref[...] = o[:, action_dim:action_dim + 1].astype(val_ref.dtype)


def pack_params(params, *, use_bf16=True):
    """Fuse policy+value weights once (hoisted out of the per-call path)."""
    (pw1, pb1, pw2, pb2, pw3, pb3,
     vw1, vb1, vw2, vb2, vw3, vb3) = params
    H = pw1.shape[1]
    A = pw3.shape[1]
    H2 = 2 * H
    wdt = jnp.bfloat16 if use_bf16 else jnp.float32
    f32 = jnp.float32
    out_cols = _round_up(A + 1, 8)         # actions + value, sublane-padded
    n3 = _round_up(out_cols, 128)          # lane-safe MXU width for layer 3

    w1c = jnp.concatenate([pw1, vw1], axis=1).astype(wdt)          # (S, 2H)
    b1c = jnp.concatenate([pb1, vb1], axis=1).astype(f32)          # (1, 2H)
    w2c = (jnp.zeros((H2, H2), f32)
           .at[:H, :H].set(pw2)
           .at[H:, H:].set(vw2)).astype(wdt)                       # (2H, 2H)
    b2c = jnp.concatenate([pb2, vb2], axis=1).astype(f32)          # (1, 2H)
    w3c = (jnp.zeros((H2, n3), f32)
           .at[:H, :A].set(pw3)
           .at[H:, A:A + 1].set(vw3)).astype(wdt)                  # (2H, 128)
    b3c = (jnp.zeros((1, out_cols), f32)
           .at[:, :A].set(pb3)
           .at[:, A:A + 1].set(vb3))                               # (1, out_cols)
    return (w1c, b1c, w2c, b2c, w3c, b3c)


@functools.partial(jax.jit, static_argnames=("action_dim", "block_b"))
def physics_informed_forward(states, packed, *, action_dim, block_b=2048):
    """states: (B, state_dim) -> (actions (B, action_dim), values (B, 1))."""
    w1c, b1c, w2c, b2c, w3c, b3c = packed
    B, state_dim = states.shape
    out_cols = b3c.shape[1]
    wdt = w1c.dtype
    out_dtype = states.dtype

    # Cast the dominant states stream before the kernel so the DMA moves bf16.
    if states.dtype != wdt:
        states = states.astype(wdt)

    # ---- batch tiling ----
    sub = 16 if wdt == jnp.bfloat16 else 8       # bf16 sublane packing
    block_b_eff = max(sub, min(block_b, _round_up(B, sub)))
    if 512 <= B <= block_b:
        # whole batch fits one tile: split into >=2 grid steps so both v7x
        # TensorCores get work (free on v5e/v6e).
        block_b_eff = _round_up(-(-B // 2), sub)
    Bp = _round_up(B, block_b_eff)
    if Bp != B:
        states = jnp.pad(states, ((0, Bp - B), (0, 0)))

    grid = (Bp // block_b_eff,)
    batch_map = lambda i: (i, 0)
    const_map = lambda i: (0, 0)
    full = lambda a: pl.BlockSpec(a.shape, const_map)

    kernel = functools.partial(_fused_kernel, action_dim, out_cols)
    actions_p, values_p = pl.pallas_call(
        kernel,
        grid_spec=pltpu.PrefetchScalarGridSpec(
            num_scalar_prefetch=0,
            grid=grid,
            in_specs=[
                pl.BlockSpec((block_b_eff, state_dim), batch_map),  # states tile
                full(w1c), full(b1c), full(w2c), full(b2c),
                full(w3c), full(b3c),
            ],
            out_specs=[
                pl.BlockSpec((block_b_eff, action_dim), batch_map),  # actions
                pl.BlockSpec((block_b_eff, 1), batch_map),           # values
            ],
        ),
        out_shape=(
            jax.ShapeDtypeStruct((Bp, action_dim), out_dtype),
            jax.ShapeDtypeStruct((Bp, 1), out_dtype),
        ),
        compiler_params=pltpu.CompilerParams(
            dimension_semantics=("parallel",)),
    )(states, w1c, b1c, w2c, b2c, w3c, b3c)

    if Bp != B:
        actions_p = actions_p[:B]
        values_p = values_p[:B]
    return actions_p, values_p


def compute_physics_loss(states, actions, next_states):
    # TODO(synk): not part of forward(); trivial elementwise mean kept in plain JAX.
    return jnp.mean((next_states - states - actions * 0.1) ** 2)


def init_params(key, state_dim, action_dim, hidden_dim=64, dtype=jnp.float32):
    """Deterministic synthetic init. Weights as (in, out); biases as (1, out)."""
    keys = jax.random.split(key, 12)

    def linear(kw, kb, fan_in, fan_out):
        # PyTorch default init: U(-1/sqrt(fan_in), 1/sqrt(fan_in))
        bound = 1.0 / jnp.sqrt(jnp.asarray(fan_in, dtype))
        w = jax.random.uniform(kw, (fan_in, fan_out), dtype, -bound, bound)
        b = jax.random.uniform(kb, (1, fan_out), dtype, -bound, bound)
        return w, b

    pw1, pb1 = linear(keys[0], keys[1], state_dim, hidden_dim)
    pw2, pb2 = linear(keys[2], keys[3], hidden_dim, hidden_dim)
    pw3, pb3 = linear(keys[4], keys[5], hidden_dim, action_dim)
    vw1, vb1 = linear(keys[6], keys[7], state_dim, hidden_dim)
    vw2, vb2 = linear(keys[8], keys[9], hidden_dim, hidden_dim)
    vw3, vb3 = linear(keys[10], keys[11], hidden_dim, 1)
    return (pw1, pb1, pw2, pb2, pw3, pb3,
            vw1, vb1, vw2, vb2, vw3, vb3)


def _reference_forward(states, params):
    (pw1, pb1, pw2, pb2, pw3, pb3,
     vw1, vb1, vw2, vb2, vw3, vb3) = params
    h = jnp.maximum(states @ pw1 + pb1, 0.0)
    h = jnp.maximum(h @ pw2 + pb2, 0.0)
    actions = jnp.tanh(h @ pw3 + pb3)
    v = jnp.maximum(states @ vw1 + vb1, 0.0)
    v = jnp.maximum(v @ vw2 + vb2, 0.0)
    values = v @ vw3 + vb3
    return actions, values


if __name__ == "__main__":
    key = jax.random.PRNGKey(0)
    k_param, k_state, k_state2 = jax.random.split(key, 3)

    B, state_dim, action_dim, hidden_dim = 8, 16, 4, 64
    params = init_params(k_param, state_dim, action_dim, hidden_dim)
    states = jax.random.normal(k_state, (B, state_dim), dtype=jnp.float32)

    # ---- f32 path: tight tolerance, single small tile ----
    ref_a, ref_v = _reference_forward(states, params)
    packed_f32 = pack_params(params, use_bf16=False)
    a32, v32 = physics_informed_forward(states, packed_f32,
                                         action_dim=action_dim)
    a32 = jax.block_until_ready(a32)
    v32 = jax.block_until_ready(v32)
    assert a32.shape == (B, action_dim) and v32.shape == (B, 1)
    assert jnp.allclose(a32, ref_a, atol=1e-5, rtol=1e-5)
    assert jnp.allclose(v32, ref_v, atol=1e-5, rtol=1e-5)

    # ---- bf16 path: larger, non-tile-multiple batch (padding + 2-step grid) ----
    B2 = 1000
    states2 = jax.random.normal(k_state2, (B2, state_dim), dtype=jnp.float32)
    ref_a2, ref_v2 = _reference_forward(states2, params)
    packed_bf16 = pack_params(params, use_bf16=True)
    a16, v16 = physics_informed_forward(states2, packed_bf16,
                                         action_dim=action_dim, block_b=2048)
    a16 = jax.block_until_ready(a16)
    v16 = jax.block_until_ready(v16)
    assert a16.shape == (B2, action_dim) and v16.shape == (B2, 1)
    assert jnp.allclose(a16, ref_a2, atol=5e-2, rtol=5e-2)
    assert jnp.allclose(v16, ref_v2, atol=5e-2, rtol=5e-2)

    print("KERNEL_OK")
</pallas_src>

<mosaic_0001>
module attributes {stable_mosaic.version = 11 : i64} {
  func.func @_fused_kernel(%arg0: i32, %arg1: memref<8x16xf32, #tpu.memory_space<vmem>>, %arg2: memref<16x128xf32, #tpu.memory_space<vmem>>, %arg3: memref<1x128xf32, #tpu.memory_space<vmem>>, %arg4: memref<128x128xf32, #tpu.memory_space<vmem>>, %arg5: memref<1x128xf32, #tpu.memory_space<vmem>>, %arg6: memref<128x128xf32, #tpu.memory_space<vmem>>, %arg7: memref<1x8xf32, #tpu.memory_space<vmem>>, %arg8: memref<8x4xf32, #tpu.memory_space<vmem>>, %arg9: memref<8x1xf32, #tpu.memory_space<vmem>>) attributes {dimension_semantics = [#tpu.dimension_semantics<parallel>], iteration_bounds = array<i64: 1>, scalar_prefetch = 0 : i64, scratch_operands = 0 : i64, tpu.core_type = #tpu.core_type<tc>, window_params = [{transform_indices = @transform_0, window_bounds = array<i64: 8, 16>}, {pipeline_mode = #tpu.pipeline_mode<synchronous>, transform_indices = @transform_1, window_bounds = array<i64: 16, 128>}, {pipeline_mode = #tpu.pipeline_mode<synchronous>, transform_indices = @transform_2, window_bounds = array<i64: 1, 128>}, {pipeline_mode = #tpu.pipeline_mode<synchronous>, transform_indices = @transform_3, window_bounds = array<i64: 128, 128>}, {pipeline_mode = #tpu.pipeline_mode<synchronous>, transform_indices = @transform_4, window_bounds = array<i64: 1, 128>}, {pipeline_mode = #tpu.pipeline_mode<synchronous>, transform_indices = @transform_5, window_bounds = array<i64: 128, 128>}, {pipeline_mode = #tpu.pipeline_mode<synchronous>, transform_indices = @transform_6, window_bounds = array<i64: 1, 8>}, {transform_indices = @transform_7, window_bounds = array<i64: 8, 4>}, {transform_indices = @transform_8, window_bounds = array<i64: 8, 1>}]} {
    %c0 = arith.constant 0 : index
    %c0_0 = arith.constant 0 : index
    %0 = vector.load %arg1[%c0, %c0_0] : memref<8x16xf32, #tpu.memory_space<vmem>>, vector<8x16xf32>
    %c0_1 = arith.constant 0 : index
    %c0_2 = arith.constant 0 : index
    %1 = vector.load %arg2[%c0_1, %c0_2] : memref<16x128xf32, #tpu.memory_space<vmem>>, vector<16x128xf32>
    %cst = arith.constant dense<0.000000e+00> : vector<8x128xf32>
    %2 = tpu.matmul %0, %1, %cst {dimension_numbers = #tpu.dot_dimension_numbers<[1], [0], [0], [1], [0, 0, 1, 1], [], []>} : vector<8x16xf32>, vector<16x128xf32>, vector<8x128xf32> -> vector<8x128xf32>
    %c0_3 = arith.constant 0 : index
    %c0_4 = arith.constant 0 : index
    %3 = vector.load %arg3[%c0_3, %c0_4] : memref<1x128xf32, #tpu.memory_space<vmem>>, vector<1x128xf32>
    %4 = vector.broadcast %3 : vector<1x128xf32> to vector<8x128xf32>
    %5 = arith.addf %2, %4 : vector<8x128xf32>
    %cst_5 = arith.constant 0.000000e+00 : f32
    %6 = vector.broadcast %cst_5 : f32 to vector<8x128xf32>
    %7 = arith.maximumf %5, %6 : vector<8x128xf32>
    %c0_6 = arith.constant 0 : index
    %c0_7 = arith.constant 0 : index
    %8 = vector.load %arg4[%c0_6, %c0_7] : memref<128x128xf32, #tpu.memory_space<vmem>>, vector<128x128xf32>
    %cst_8 = arith.constant dense<0.000000e+00> : vector<8x128xf32>
    %9 = tpu.matmul %7, %8, %cst_8 {dimension_numbers = #tpu.dot_dimension_numbers<[1], [0], [0], [1], [0, 0, 1, 1], [], []>} : vector<8x128xf32>, vector<128x128xf32>, vector<8x128xf32> -> vector<8x128xf32>
    %c0_9 = arith.constant 0 : index
    %c0_10 = arith.constant 0 : index
    %10 = vector.load %arg5[%c0_9, %c0_10] : memref<1x128xf32, #tpu.memory_space<vmem>>, vector<1x128xf32>
    %11 = vector.broadcast %10 : vector<1x128xf32> to vector<8x128xf32>
    %12 = arith.addf %9, %11 : vector<8x128xf32>
    %cst_11 = arith.constant 0.000000e+00 : f32
    %13 = vector.broadcast %cst_11 : f32 to vector<8x128xf32>
    %14 = arith.maximumf %12, %13 : vector<8x128xf32>
    %c0_12 = arith.constant 0 : index
    %c0_13 = arith.constant 0 : index
    %15 = vector.load %arg6[%c0_12, %c0_13] : memref<128x128xf32, #tpu.memory_space<vmem>>, vector<128x128xf32>
    %cst_14 = arith.constant dense<0.000000e+00> : vector<8x128xf32>
    %16 = tpu.matmul %14, %15, %cst_14 {dimension_numbers = #tpu.dot_dimension_numbers<[1], [0], [0], [1], [0, 0, 1, 1], [], []>} : vector<8x128xf32>, vector<128x128xf32>, vector<8x128xf32> -> vector<8x128xf32>
    %17 = vector.extract_strided_slice %16 {offsets = [0, 0], sizes = [8, 8], strides = [1, 1]} : vector<8x128xf32> to vector<8x8xf32>
    %c0_15 = arith.constant 0 : index
    %c0_16 = arith.constant 0 : index
    %18 = vector.load %arg7[%c0_15, %c0_16] : memref<1x8xf32, #tpu.memory_space<vmem>>, vector<1x8xf32>
    %19 = vector.broadcast %18 : vector<1x8xf32> to vector<8x8xf32>
    %20 = arith.addf %17, %19 : vector<8x8xf32>
    %21 = vector.extract_strided_slice %20 {offsets = [0, 0], sizes = [8, 4], strides = [1, 1]} : vector<8x8xf32> to vector<8x4xf32>
    %22 = math.tanh %21 : vector<8x4xf32>
    %c0_17 = arith.constant 0 : index
    %c0_18 = arith.constant 0 : index
    %23 = vector.load %arg8[%c0_17, %c0_18] : memref<8x4xf32, #tpu.memory_space<vmem>>, vector<8x4xf32>
    tpu.vector_store %arg8[%c0_17, %c0_18], %22 {strides = array<i32>} : memref<8x4xf32, #tpu.memory_space<vmem>>, vector<8x4xf32>,
    %24 = vector.extract_strided_slice %20 {offsets = [0, 4], sizes = [8, 1], strides = [1, 1]} : vector<8x8xf32> to vector<8x1xf32>
    %c0_19 = arith.constant 0 : index
    %c0_20 = arith.constant 0 : index
    %25 = vector.load %arg9[%c0_19, %c0_20] : memref<8x1xf32, #tpu.memory_space<vmem>>, vector<8x1xf32>
    tpu.vector_store %arg9[%c0_19, %c0_20], %24 {strides = array<i32>} : memref<8x1xf32, #tpu.memory_space<vmem>>, vector<8x1xf32>,
    return
  }
  func.func @transform_0(%arg0: i32) -> (i32, i32) {
    %c0_i32 = arith.constant 0 : i32
    %c0_i32_0 = arith.constant 0 : i32
    return %arg0, %c0_i32 : i32, i32
  }
  func.func @transform_1(%arg0: i32) -> (i32, i32) {
    %c0_i32 = arith.constant 0 : i32
    %c0_i32_0 = arith.constant 0 : i32
    %c0_i32_1 = arith.constant 0 : i32
    return %c0_i32, %c0_i32_0 : i32, i32
  }
  func.func @transform_2(%arg0: i32) -> (i32, i32) {
    %c0_i32 = arith.constant 0 : i32
    %c0_i32_0 = arith.constant 0 : i32
    %c0_i32_1 = arith.constant 0 : i32
    return %c0_i32, %c0_i32_0 : i32, i32
  }
  func.func @transform_3(%arg0: i32) -> (i32, i32) {
    %c0_i32 = arith.constant 0 : i32
    %c0_i32_0 = arith.constant 0 : i32
    %c0_i32_1 = arith.constant 0 : i32
    return %c0_i32, %c0_i32_0 : i32, i32
  }
  func.func @transform_4(%arg0: i32) -> (i32, i32) {
    %c0_i32 = arith.constant 0 : i32
    %c0_i32_0 = arith.constant 0 : i32
    %c0_i32_1 = arith.constant 0 : i32
    return %c0_i32, %c0_i32_0 : i32, i32
  }
  func.func @transform_5(%arg0: i32) -> (i32, i32) {
    %c0_i32 = arith.constant 0 : i32
    %c0_i32_0 = arith.constant 0 : i32
    %c0_i32_1 = arith.constant 0 : i32
    return %c0_i32, %c0_i32_0 : i32, i32
  }
  func.func @transform_6(%arg0: i32) -> (i32, i32) {
    %c0_i32 = arith.constant 0 : i32
    %c0_i32_0 = arith.constant 0 : i32
    %c0_i32_1 = arith.constant 0 : i32
    return %c0_i32, %c0_i32_0 : i32, i32
  }
  func.func @transform_7(%arg0: i32) -> (i32, i32) {
    %c0_i32 = arith.constant 0 : i32
    %c0_i32_0 = arith.constant 0 : i32
    return %arg0, %c0_i32 : i32, i32
  }
  func.func @transform_8(%arg0: i32) -> (i32, i32) {
    %c0_i32 = arith.constant 0 : i32
    %c0_i32_0 = arith.constant 0 : i32
    return %arg0, %c0_i32 : i32, i32
  }
}

</mosaic_0001>

<bundles_post_ra>
// kernel: physics_informed_forward.1
= control target key start
LH: loop header
LB: loop body
LE: loop exit
PB: predicated region body
PF: predicated region fallthrough
CT: control target
= control target key end

     0   :  { %14 = vsyncpa [#allocation3], 0  ;;  %s796_s0 = inlined_call_operand.hbm [shape: f32[8,16], index: 0, kind: input, shape index: {}]   ;;  %s797_s1 = inlined_call_operand.hbm [shape: f32[16,128], index: 1, kind: input, shape index: {}]   ;;  %s798_s2 = inlined_call_operand.vmem [shape: f32[1,128], index: 2, kind: input, shape index: {}]   ;;  %s799_s3 = inlined_call_operand.hbm [shape: f32[128,128], index: 3, kind: input, shape index: {}]   ;;  %s800_s4 = inlined_call_operand.vmem [shape: f32[1,128], index: 4, kind: input, shape index: {}]   ;;  %s801_s5 = inlined_call_operand.hbm [shape: f32[128,128], index: 5, kind: input, shape index: {}]   ;;  %s802_s6 = inlined_call_operand.vmem [shape: f32[1,8], index: 6, kind: input, shape index: {}]   ;;  %s803_s7 = inlined_call_operand.vmem [shape: f32[8,4], index: 7, kind: output, shape index: {0}]   ;;  %s804_s8 = inlined_call_operand.vmem [shape: f32[8,1], index: 8, kind: output, shape index: {1}]  }
   0x1   :  { %15 = vsyncpa [#allocation5], 0 }
   0x2   :  { %16 = vsyncpa [#allocation8], 0  ;;  %s649_s27 = smov [#allocation4]   ;;  %s555_s9 = scalar_lea.hbm %s797_s1, 256 }
   0x3   :  { %s32_s28 = sshll.u32 %s649_s27, 4  ;;  %p556_p0 = scmp.ne.s32.totalorder %s797_s1, %s555_s9  ;;  %s33_s28 = int_to_ptr.vmem [resolvable:$true] %s32_s28 }
   0x4   :  { %p559_p1 = scmp.lt.u32.totalorder %s555_s9, %s797_s1 }
   0x6   :  { %p561_p2 = pnand %p559_p1, %p556_p0 }
   0x8   :  { %564 = shalt.err (!%p561_p2)
}
   0x9   :  { %s565_s14 = scalar_lea.vmem %s33_s28, 256  ;;  %p570_p4 = scmp.lt.s32.totalorder %s33_s28, %s33_s28 }
   0xa   :  { %p566_p3 = scmp.ne.s32.totalorder %s33_s28, %s565_s14  ;;  %p571_p5 = scmp.lt.s32.totalorder %s565_s14, %s565_s14 }
   0xc   :  { %p572_p6 = por %p571_p5, %p570_p4 }
   0xe   :  { %p573_p7 = pnand %p572_p6, %p566_p3 }
  0x10   :  { %576 = shalt.err (!%p573_p7)
}
  0x11   :  { %s650_s15 = smov 128   ;;  %s651_s16 = smov 8  }
  0x12   :  { %38 = dma.hbm_to_vmem [thread:$0]  %s797_s1, 256, %s33_s28, [#allocation5], %s650_s15, %s650_s15, %s651_s16  }
  0x13   :  { %s652_s19 = smov [#allocation2]   ;;  %s653_s21 = smov [#allocation6]  }
  0x14   :  { %s23_s20 = sshll.u32 %s652_s19, 4  ;;  %s46_s22 = sshll.u32 %s653_s21, 4  ;;  %s24_s20 = int_to_ptr.vmem [resolvable:$true] %s23_s20  ;;  %s47_s22 = int_to_ptr.vmem [resolvable:$true] %s46_s22 }
  0x15   :  { %s577_s25 = scalar_lea.hbm %s796_s0, 128 }
  0x16   :  { %p578_p8 = scmp.ne.s32.totalorder %s796_s0, %s577_s25  ;;  %p581_p9 = scmp.lt.u32.totalorder %s577_s25, %s796_s0 }
  0x18   :  { %p583_p10 = pnand %p581_p9, %p578_p8 }
  0x1a   :  { %586 = shalt.err (!%p583_p10)
}
  0x1b   :  { %s587_s1 = scalar_lea.vmem %s24_s20, 128  ;;  %p592_p12 = scmp.lt.s32.totalorder %s24_s20, %s24_s20 }
  0x1c   :  { %p588_p11 = scmp.ne.s32.totalorder %s24_s20, %s587_s1  ;;  %p593_p13 = scmp.lt.s32.totalorder %s587_s1, %s587_s1 }
  0x1e   :  { %p594_p0 = por %p593_p13, %p592_p12 }
  0x20   :  { %p595_p1 = pnand %p594_p0, %p588_p11 }
  0x22   :  { %598 = shalt.err (!%p595_p1)
}
  0x23   :  { %26 = dma.hbm_to_vmem [thread:$0]  %s796_s0, 128, %s24_s20, [#allocation3]  }
  0x24   :  { %s599_s12 = scalar_lea.hbm %s799_s3, 2048 }
  0x25   :  { %p600_p2 = scmp.ne.s32.totalorder %s799_s3, %s599_s12  ;;  %p603_p3 = scmp.lt.u32.totalorder %s599_s12, %s799_s3 }
  0x27   :  { %p605_p4 = pnand %p603_p3, %p600_p2 }
  0x29   :  { %608 = shalt.err (!%p605_p4)
}
  0x2a   :  { %s609_s19 = scalar_lea.vmem %s47_s22, 2048  ;;  %p614_p6 = scmp.lt.s32.totalorder %s47_s22, %s47_s22 }
  0x2b   :  { %p610_p5 = scmp.ne.s32.totalorder %s47_s22, %s609_s19  ;;  %p615_p7 = scmp.lt.s32.totalorder %s609_s19, %s609_s19 }
  0x2d   :  { %p616_p8 = por %p615_p7, %p614_p6 }
  0x2f   :  { %p617_p9 = pnand %p616_p8, %p610_p5 }
  0x31   :  { %620 = shalt.err (!%p617_p9)
}
  0x32   :  { %52 = dma.hbm_to_vmem [thread:$0]  %s799_s3, 2048, %s47_s22, [#allocation5], %s650_s15, %s650_s15, %s651_s16  }
  0x33   :  { %s654_s21 = smov [#allocation7]   ;;  %s621_s26 = scalar_lea.hbm %s801_s5, 2048 }
  0x34   :  { %s60_s23 = sshll.u32 %s654_s21, 4  ;;  %p622_p10 = scmp.ne.s32.totalorder %s801_s5, %s621_s26  ;;  %s61_s23 = int_to_ptr.vmem [resolvable:$true] %s60_s23 }
  0x35   :  { %p625_p11 = scmp.lt.u32.totalorder %s621_s26, %s801_s5 }
  0x37   :  { %p627_p12 = pnand %p625_p11, %p622_p10 }
  0x39   :  { %630 = shalt.err (!%p627_p12)
}
  0x3a   :  { %s631_s28 = scalar_lea.vmem %s61_s23, 2048  ;;  %p636_p0 = scmp.lt.s32.totalorder %s61_s23, %s61_s23 }
  0x3b   :  { %p632_p13 = scmp.ne.s32.totalorder %s61_s23, %s631_s28  ;;  %p637_p1 = scmp.lt.s32.totalorder %s631_s28, %s631_s28 }
  0x3d   :  { %p638_p2 = por %p637_p1, %p636_p0 }
  0x3f   :  { %p639_p3 = pnand %p638_p2, %p632_p13 }
  0x41   :  { %642 = shalt.err (!%p639_p3)
}
  0x42   :  { %66 = dma.hbm_to_vmem [thread:$0]  %s801_s5, 2048, %s61_s23, [#allocation8], %s650_s15, %s650_s15, %s651_s16  }
  0x43   :  { %643 = dma.done.wait [#allocation3], 128  }
  0x44   :  { %644 = vsyncadd [#allocation3], 4294967168 }
  0x45   :  { %645 = dma.done.wait [#allocation5], 2304  }
  0x46   :  { %646 = vsyncadd [#allocation5], 4294964992 }
  0x47   :  { %647 = dma.done.wait [#allocation8], 2048  }
  0x48   :  { %648 = vsyncadd [#allocation8], 4294965248  ;;  %v655_v0 = vmov 0.0|0.0   ;;  %vm656_vm0 = vmmov 0   ;;  %v657_v1 = vmov 0.0   ;;  %v82_v2 = vld [vmem:[#allocation4] sm:$0xff] }
  0x49   :  { %492 = vmatprep.subr.bf16.mxu0 %v655_v0  ;;  %419 = vmatprep.mubr.msk.f32.mxu0 %vm656_vm0, %v657_v1  ;;  %v83_v3 = vld [vmem:[#allocation4 + $0x8] sm:$0xff]  ;;  %v166_v5 = vld [vmem:[#allocation6] sm:$0xff]  ;;  %v167_v6 = vld [vmem:[#allocation6 + $0x8] sm:$0xff]  ;;  %vm91_vm1 = vcmask 130048   ;;  %s658_s11 = smov 124   ;;  %vm355_vm2 = vcmask 31744  }
  0x4a   :  { %495 = vmatprep.subr.bf16.mxu1 %v655_v0  ;;  %454 = vmatprep.mubr.msk.f32.mxu1 %vm656_vm0, %v657_v1  ;;  %v493_v4 = vpack.c.bf16 %v83_v3, %v82_v2  ;;  %v168_v7 = vld [vmem:[#allocation6 + $0x10] sm:$0xff]  ;;  %v496_v8 = vpack.c.bf16 %v167_v6, %v166_v5  ;;  %v169_v9 = vld [vmem:[#allocation6 + $0x18] sm:$0xff]  ;;  %v81_v10 = vld [vmem:[#allocation2] sm:$0xff]  ;;  %vm361_vm3 = vcmask 7168  }
  0x4b   :  { %v499_v11 = vpack.c.bf16 %v169_v9, %v168_v7  ;;  %v170_v12 = vld [vmem:[#allocation6 + $0x20] sm:$0xff]  ;;  %v171_v13 = vld [vmem:[#allocation6 + $0x28] sm:$0xff]  ;;  %v172_v15 = vld [vmem:[#allocation6 + $0x30] sm:$0xff] }
  0x4c   :  { %494 = vmatpush3.bf16.msra.mxu0 %v493_v4  ;;  %497 = vmatpush3.bf16.msra.mxu1 %v496_v8  ;;  %v502_v14 = vpack.c.bf16 %v171_v13, %v170_v12  ;;  %v173_v16 = vld [vmem:[#allocation6 + $0x38] sm:$0xff]  ;;  %v174_v18 = vld [vmem:[#allocation6 + $0x40] sm:$0xff]  ;;  %v175_v19 = vld [vmem:[#allocation6 + $0x48] sm:$0xff] }
  0x4d   :  { %519 = vmatprep.subr.bf16.mxu0 %v655_v0  ;;  %498 = vmatprep.subr.bf16.mxu1 %v655_v0  ;;  %v505_v17 = vpack.c.bf16 %v173_v16, %v172_v15  ;;  %v508_v20 = vpack.c.bf16 %v175_v19, %v174_v18  ;;  %v176_v21 = vld [vmem:[#allocation6 + $0x50] sm:$0xff]  ;;  %v177_v22 = vld [vmem:[#allocation6 + $0x58] sm:$0xff]  ;;  %v178_v24 = vld [vmem:[#allocation6 + $0x60] sm:$0xff] }
  0x4e   :  { %v511_v23 = vpack.c.bf16 %v177_v22, %v176_v21  ;;  %v179_v25 = vld [vmem:[#allocation6 + $0x68] sm:$0xff]  ;;  %v180_v27 = vld [vmem:[#allocation6 + $0x70] sm:$0xff]  ;;  %v181_v28 = vld [vmem:[#allocation6 + $0x78] sm:$0xff] }
  0x4f   :  { %420 = vmatmul.mubr.msk.f32.vlgmr.msra.gmra.mrb[0].mxu0 %vm91_vm1, %v81_v10  ;;  %v514_v26 = vpack.c.bf16 %v179_v25, %v178_v24  ;;  %v517_v29 = vpack.c.bf16 %v181_v28, %v180_v27  ;;  %v260_v30 = vld [vmem:[#allocation7] sm:$0xff]  ;;  %v261_v31 = vld [vmem:[#allocation7 + $0x8] sm:$0xff]  ;;  %v262_v32 = vld [vmem:[#allocation7 + $0x10] sm:$0xff] }
  0x50   :  { %489 = vmatprep.mubr.msk.f32.mxu0 %vm656_vm0, %v657_v1  ;;  %500 = vmatpush3.bf16.msra.mxu1 %v499_v11  ;;  %v520_v33 = vpack.c.bf16 %v261_v31, %v260_v30  ;;  %v263_v34 = vld [vmem:[#allocation7 + $0x18] sm:$0xff]  ;;  %v264_v36 = vld [vmem:[#allocation7 + $0x20] sm:$0xff]  ;;  %v265_v37 = vld [vmem:[#allocation7 + $0x28] sm:$0xff] }
  0x51   :  { %501 = vmatprep.subr.bf16.mxu1 %v655_v0  ;;  %v523_v35 = vpack.c.bf16 %v263_v34, %v262_v32  ;;  %v526_v38 = vpack.c.bf16 %v265_v37, %v264_v36  ;;  %v266_v39 = vld [vmem:[#allocation7 + $0x30] sm:$0xff]  ;;  %v267_v40 = vld [vmem:[#allocation7 + $0x38] sm:$0xff]  ;;  %v268_v42 = vld [vmem:[#allocation7 + $0x40] sm:$0xff] }
  0x52   :  { %521 = vmatpush3.bf16.msra.mxu0 %v520_v33  ;;  %v529_v41 = vpack.c.bf16 %v267_v40, %v266_v39  ;;  %v269_v43 = vld [vmem:[#allocation7 + $0x48] sm:$0xff]  ;;  %v270_v45 = vld [vmem:[#allocation7 + $0x50] sm:$0xff]  ;;  %v271_v46 = vld [vmem:[#allocation7 + $0x58] sm:$0xff] }
  0x53   :  { %522 = vmatprep.subr.bf16.mxu0 %v655_v0  ;;  %v532_v44 = vpack.c.bf16 %v269_v43, %v268_v42  ;;  %v535_v47 = vpack.c.bf16 %v271_v46, %v270_v45  ;;  %v272_v48 = vld [vmem:[#allocation7 + $0x60] sm:$0xff]  ;;  %v273_v49 = vld [vmem:[#allocation7 + $0x68] sm:$0xff]  ;;  %v274_v56 = vld [vmem:[#allocation7 + $0x70] sm:$0xff] }
  0x54   :  { %503 = vmatpush3.bf16.msra.mxu1 %v502_v14  ;;  %v538_v50 = vpack.c.bf16 %v273_v49, %v272_v48  ;;  %v374_v51 = vld [vmem:[%s798_s2] ss:$0 sm:$0xff]  ;;  %v275_v57 = vld [vmem:[#allocation7 + $0x78] sm:$0xff] }
  0x55   :  { %504 = vmatprep.subr.bf16.mxu1 %v655_v0  ;;  %v541_v58 = vpack.c.bf16 %v275_v57, %v274_v56  ;;  %v376_v59 = vld [vmem:[%s800_s4] ss:$0 sm:$0xff] }
  0x56   :  { %524 = vmatpush3.bf16.msra.mxu0 %v523_v35 }
  0x57   :  { %525 = vmatprep.subr.bf16.mxu0 %v655_v0 }
  0x58   :  { %506 = vmatpush3.bf16.msra.mxu1 %v505_v17 }
  0x59   :  { %507 = vmatprep.subr.bf16.mxu1 %v655_v0 }
  0x5a   :  { %527 = vmatpush3.bf16.msra.mxu0 %v526_v38 }
  0x5b   :  { %528 = vmatprep.subr.bf16.mxu0 %v655_v0 }
  0x5c   :  { %509 = vmatpush3.bf16.msra.mxu1 %v508_v20 }
  0x5d   :  { %510 = vmatprep.subr.bf16.mxu1 %v655_v0 }
  0x5e   :  { %530 = vmatpush3.bf16.msra.mxu0 %v529_v41 }
  0x5f   :  { %531 = vmatprep.subr.bf16.mxu0 %v655_v0 }
  0x60   :  { %512 = vmatpush3.bf16.msra.mxu1 %v511_v23 }
  0x61   :  { %513 = vmatprep.subr.bf16.mxu1 %v655_v0 }
  0x62   :  { %533 = vmatpush3.bf16.msra.mxu0 %v532_v44 }
  0x63   :  { %534 = vmatprep.subr.bf16.mxu0 %v655_v0 }
  0x64   :  { %515 = vmatpush3.bf16.msra.mxu1 %v514_v26 }
  0x65   :  { %516 = vmatprep.subr.bf16.mxu1 %v655_v0 }
  0x66   :  { %536 = vmatpush3.bf16.msra.mxu0 %v535_v47 }
  0x67   :  { %537 = vmatprep.subr.bf16.mxu0 %v655_v0 }
  0x68   :  { %518 = vmatpush3.bf16.msra.mxu1 %v517_v29 }
  0x6a   :  { %539 = vmatpush3.bf16.msra.mxu0 %v538_v50 }
  0x6b   :  { %540 = vmatprep.subr.bf16.mxu0 %v655_v0  ;;  %v377_v0 = vld [vmem:[%s802_s6] ss:$0 sm:$0xff] }
  0x6e   :  { %542 = vmatpush3.bf16.msra.mxu0 %v541_v58 }
 0x122   :  { %v161_v52 = vpop.f32.mrb[0].mxu0 }
 0x123   :  { %v162_v53 = vadd.f32 %v374_v51, %v161_v52  ;;  %v421_v54 = vpop.f32.mrb[1].mxu0 }
 0x125   :  { %v165_v55 = vmax.f32 %v162_v53, 0.0 }
 0x127   :  { %455 = vmatmul.mubr.f32.vlgmr.msra.gmra.mrb[0].mxu1 %v165_v55 }
 0x1fa   :  { %v255_v60 = vpop.f32.mrb[0].mxu1 }
 0x1fb   :  { %v256_v61 = vadd.f32 %v376_v59, %v255_v60  ;;  %v456_v62 = vpop.f32.mrb[1].mxu1 }
 0x1fd   :  { %v259_v63 = vmax.f32 %v256_v61, 0.0 }
 0x1ff   :  { %490 = vmatmul.mubr.f32.vlgmr.msra.gmra.mrb[2].mxu0 %v259_v63 }
 0x2d2   :  { %v342_v1 = vpop.f32.mrb[2].mxu0 }
 0x2d3   :  { %v353_v2 = vadd.f32 %v377_v0, %v342_v1  ;;  %v491_v3 = vpop.f32.mrb[3].mxu0 }
 0x2d5   :  { %553 = vtanh.f32 %v353_v2  ;;  %358 = vrot.lane.b32.xlu0 %v353_v2, %s658_s11 }
 0x2df   :  { %v554_v4 = vpop.eup %553 }
 0x2e0   :  { %356 = vst.msk [vmem:[%s803_s7] sm:$0xff] %vm355_vm2, %v554_v4 }
 0x347   :  { %v359_v5 = vpop.permute.xlu0 %358 }
 0x348   :  { %362 = vst.msk [vmem:[%s804_s8] sm:$0xff] %vm361_vm3, %v359_v5 }
 0x349   :  { %371 = vsyncpa [#allocation3], 1 }
 0x34a   :  { %372 = vsyncpa [#allocation5], 1 }
 0x34b   :  { %373 = vsyncpa [#allocation8], 1 }

</bundles_post_ra>
